<compile_context>
chip_gen: v7x
topology: tpu7x:2x2x1
jax: 0.10.0
libtpu: 0.0.40
codegen_flags: <defaults>
</compile_context>

<pallas_src>
import math

import jax
import jax.numpy as jnp
from jax.experimental import pallas as pl
from jax.experimental.pallas import tpu as pltpu


def _gcn_kernel(x_ref, w_ref, adj_ref, b_ref, o_ref, acc_ref):
    k = pl.program_id(1)

    @pl.when(k == 0)
    def _():
        acc_ref[...] = jnp.zeros_like(acc_ref)

    # support_k = X_k @ W   (TK, F_in_p) @ (F_in_p, F_out_p) on the MXU (bf16)
    support = jnp.dot(x_ref[...], w_ref[...], preferred_element_type=jnp.float32)
    # acc += A_{i,k} @ support_k   (TM, TK) @ (TK, F_out_p), f32 accumulate
    acc_ref[...] += jnp.dot(
        adj_ref[...], support.astype(adj_ref.dtype),
        preferred_element_type=jnp.float32,
    )

    # Epilogue only on the last K tile: bias add + cast, lane-dense store.
    @pl.when(k == pl.num_programs(1) - 1)
    def _():
        o_ref[...] = (acc_ref[...] + b_ref[...]).astype(o_ref.dtype)


def _round_up(x, m):
    return ((x + m - 1) // m) * m


def gcn_forward(x, adj, weight, bias=None, *, compute_dtype=jnp.bfloat16):
    """Pallas GCN layer: adj @ (x @ weight) + bias.

    x:      (N, F_in)      float32
    adj:    (N, N)         float32 (dense normalized adjacency)
    weight: (F_in, F_out)  float32
    bias:   (F_out,)       float32 or None
    returns (N, F_out)     float32
    """
    n, f_in = x.shape
    f_in_w, f_out = weight.shape
    assert f_in_w == f_in, "weight rows must match input features"
    out_dtype = x.dtype

    # Lane-dense padding of feature dims (multiples of 128 lanes).
    f_in_p = _round_up(f_in, 128)
    f_out_p = _round_up(f_out, 128)

    # Row / K tile size: cap at 512 so double-buffered bf16 tiles fit the
    # default scoped-VMEM limits on every generation (incl. v7x's 64 MiB VMEM).
    tile = min(512, _round_up(n, 128))
    n_p = _round_up(n, tile)
    tm = tk = tile

    # Pad and cast streaming operands to bf16 (halves the dominant adj traffic).
    xp = jnp.zeros((n_p, f_in_p), compute_dtype).at[:n, :f_in].set(
        x.astype(compute_dtype))
    adjp = jnp.zeros((n_p, n_p), compute_dtype).at[:n, :n].set(
        adj.astype(compute_dtype))
    wp = jnp.zeros((f_in_p, f_out_p), compute_dtype).at[:f_in, :f_out].set(
        weight.astype(compute_dtype))
    if bias is None:
        bp = jnp.zeros((1, f_out_p), jnp.float32)
    else:
        bp = jnp.zeros((1, f_out_p), jnp.float32).at[0, :f_out].set(
            bias.astype(jnp.float32))

    grid = (n_p // tm, n_p // tk)  # (row tiles: parallel, K tiles: reduction)

    out_p = pl.pallas_call(
        _gcn_kernel,
        out_shape=jax.ShapeDtypeStruct((n_p, f_out_p), jnp.float32),
        grid_spec=pltpu.PrefetchScalarGridSpec(
            num_scalar_prefetch=0,
            grid=grid,
            in_specs=[
                pl.BlockSpec((tk, f_in_p), lambda i, k: (k, 0)),        # x
                pl.BlockSpec((f_in_p, f_out_p), lambda i, k: (0, 0)),   # weight
                pl.BlockSpec((tm, tk), lambda i, k: (i, k)),            # adj
                pl.BlockSpec((1, f_out_p), lambda i, k: (0, 0)),        # bias
            ],
            out_specs=pl.BlockSpec((tm, f_out_p), lambda i, k: (i, 0)),
            scratch_shapes=[pltpu.VMEM((tm, f_out_p), jnp.float32)],
        ),
        compiler_params=pltpu.CompilerParams(
            dimension_semantics=("parallel", "arbitrary"),
        ),
    )(xp, wp, adjp, bp)

    return out_p[:n, :f_out].astype(out_dtype)


def init_gcn_params(key, in_features, out_features, with_bias=True):
    """Deterministic init matching GraphConvolution.reset_parameters():
    uniform(-stdv, stdv) with stdv = 1/sqrt(out_features)."""
    stdv = 1.0 / math.sqrt(out_features)
    kw, kb = jax.random.split(key)
    weight = jax.random.uniform(
        kw, (in_features, out_features), dtype=jnp.float32, minval=-stdv, maxval=stdv
    )
    bias = None
    if with_bias:
        bias = jax.random.uniform(
            kb, (out_features,), dtype=jnp.float32, minval=-stdv, maxval=stdv
        )
    return weight, bias


if __name__ == "__main__":
    key = jax.random.PRNGKey(0)
    k_x, k_adj, k_params = jax.random.split(key, 3)

    # Small GCN problem: N nodes, in_features -> out_features
    N, F_IN, F_OUT = 128, 64, 32

    x = jax.random.normal(k_x, (N, F_IN), dtype=jnp.float32)

    # Dense symmetric "normalized adjacency"-like matrix (synthetic).
    a = jax.random.uniform(k_adj, (N, N), dtype=jnp.float32)
    a = (a < 0.1).astype(jnp.float32)
    a = a + a.T + jnp.eye(N, dtype=jnp.float32)
    deg = jnp.clip(a.sum(axis=1), 1.0, None)
    d_inv_sqrt = 1.0 / jnp.sqrt(deg)
    adj = a * d_inv_sqrt[:, None] * d_inv_sqrt[None, :]

    weight, bias = init_gcn_params(k_params, F_IN, F_OUT, with_bias=True)

    out = gcn_forward(x, adj, weight, bias)
    out = jax.block_until_ready(out)

    # Reference check in plain JAX (f32); tolerance accounts for bf16 operands.
    ref = adj @ (x @ weight) + bias[None, :]
    assert out.shape == (N, F_OUT)
    assert out.dtype == jnp.float32
    assert jnp.allclose(out, ref, atol=5e-2, rtol=5e-2)

    print("KERNEL_OK")
</pallas_src>

<mosaic_0001>
module attributes {stable_mosaic.version = 11 : i64} {
  func.func @_gcn_kernel(%arg0: i32, %arg1: i32, %arg2: memref<128x128xbf16, #tpu.memory_space<vmem>>, %arg3: memref<128x128xbf16, #tpu.memory_space<vmem>>, %arg4: memref<128x128xbf16, #tpu.memory_space<vmem>>, %arg5: memref<1x128xf32, #tpu.memory_space<vmem>>, %arg6: memref<128x128xf32, #tpu.memory_space<vmem>>, %arg7: memref<128x128xf32, #tpu.memory_space<vmem>>) attributes {dimension_semantics = [#tpu.dimension_semantics<parallel>, #tpu.dimension_semantics<arbitrary>], iteration_bounds = array<i64: 1, 1>, scalar_prefetch = 0 : i64, scratch_operands = 1 : i64, tpu.core_type = #tpu.core_type<tc>, window_params = [{transform_indices = @transform_0, window_bounds = array<i64: 128, 128>}, {pipeline_mode = #tpu.pipeline_mode<synchronous>, transform_indices = @transform_1, window_bounds = array<i64: 128, 128>}, {transform_indices = @transform_2, window_bounds = array<i64: 128, 128>}, {pipeline_mode = #tpu.pipeline_mode<synchronous>, transform_indices = @transform_3, window_bounds = array<i64: 1, 128>}, {transform_indices = @transform_4, window_bounds = array<i64: 128, 128>}]} {
    %c0_i32 = arith.constant 0 : i32
    %0 = arith.cmpi eq, %arg1, %c0_i32 : i32
    %1 = arith.extui %0 : i1 to i32
    %c0_i32_0 = arith.constant 0 : i32
    %2 = arith.cmpi ne, %1, %c0_i32_0 : i32
    scf.if %2 {
      %cst_13 = arith.constant 0.000000e+00 : f32
      %15 = vector.broadcast %cst_13 : f32 to vector<128x128xf32>
      %c0_14 = arith.constant 0 : index
      %c0_15 = arith.constant 0 : index
      %16 = vector.load %arg7[%c0_14, %c0_15] : memref<128x128xf32, #tpu.memory_space<vmem>>, vector<128x128xf32>
      tpu.vector_store %arg7[%c0_14, %c0_15], %15 {strides = array<i32>} : memref<128x128xf32, #tpu.memory_space<vmem>>, vector<128x128xf32>,
    } else {
    }
    %c0 = arith.constant 0 : index
    %c0_1 = arith.constant 0 : index
    %3 = vector.load %arg2[%c0, %c0_1] : memref<128x128xbf16, #tpu.memory_space<vmem>>, vector<128x128xbf16>
    %c0_2 = arith.constant 0 : index
    %c0_3 = arith.constant 0 : index
    %4 = vector.load %arg3[%c0_2, %c0_3] : memref<128x128xbf16, #tpu.memory_space<vmem>>, vector<128x128xbf16>
    %cst = arith.constant dense<0.000000e+00> : vector<128x128xf32>
    %5 = tpu.matmul %3, %4, %cst {dimension_numbers = #tpu.dot_dimension_numbers<[1], [0], [0], [1], [0, 0, 1, 1], [], []>} : vector<128x128xbf16>, vector<128x128xbf16>, vector<128x128xf32> -> vector<128x128xf32>
    %c0_4 = arith.constant 0 : index
    %c0_5 = arith.constant 0 : index
    %6 = vector.load %arg7[%c0_4, %c0_5] : memref<128x128xf32, #tpu.memory_space<vmem>>, vector<128x128xf32>
    %c0_6 = arith.constant 0 : index
    %c0_7 = arith.constant 0 : index
    %7 = vector.load %arg4[%c0_6, %c0_7] : memref<128x128xbf16, #tpu.memory_space<vmem>>, vector<128x128xbf16>
    %8 = arith.truncf %5 : vector<128x128xf32> to vector<128x128xbf16>
    %cst_8 = arith.constant dense<0.000000e+00> : vector<128x128xf32>
    %9 = tpu.matmul %7, %8, %cst_8 {dimension_numbers = #tpu.dot_dimension_numbers<[1], [0], [0], [1], [0, 0, 1, 1], [], []>} : vector<128x128xbf16>, vector<128x128xbf16>, vector<128x128xf32> -> vector<128x128xf32>
    %10 = arith.addf %6, %9 : vector<128x128xf32>
    %c0_9 = arith.constant 0 : index
    %c0_10 = arith.constant 0 : index
    %11 = vector.load %arg7[%c0_9, %c0_10] : memref<128x128xf32, #tpu.memory_space<vmem>>, vector<128x128xf32>
    tpu.vector_store %arg7[%c0_9, %c0_10], %10 {strides = array<i32>} : memref<128x128xf32, #tpu.memory_space<vmem>>, vector<128x128xf32>,
    %c0_i32_11 = arith.constant 0 : i32
    %12 = arith.cmpi eq, %arg1, %c0_i32_11 : i32
    %13 = arith.extui %12 : i1 to i32
    %c0_i32_12 = arith.constant 0 : i32
    %14 = arith.cmpi ne, %13, %c0_i32_12 : i32
    scf.if %14 {
      %c0_13 = arith.constant 0 : index
      %c0_14 = arith.constant 0 : index
      %15 = vector.load %arg7[%c0_13, %c0_14] : memref<128x128xf32, #tpu.memory_space<vmem>>, vector<128x128xf32>
      %c0_15 = arith.constant 0 : index
      %c0_16 = arith.constant 0 : index
      %16 = vector.load %arg5[%c0_15, %c0_16] : memref<1x128xf32, #tpu.memory_space<vmem>>, vector<1x128xf32>
      %17 = vector.broadcast %16 : vector<1x128xf32> to vector<128x128xf32>
      %18 = arith.addf %15, %17 : vector<128x128xf32>
      %c0_17 = arith.constant 0 : index
      %c0_18 = arith.constant 0 : index
      %19 = vector.load %arg6[%c0_17, %c0_18] : memref<128x128xf32, #tpu.memory_space<vmem>>, vector<128x128xf32>
      tpu.vector_store %arg6[%c0_17, %c0_18], %18 {strides = array<i32>} : memref<128x128xf32, #tpu.memory_space<vmem>>, vector<128x128xf32>,
    } else {
    }
    return
  }
  func.func @transform_0(%arg0: i32, %arg1: i32) -> (i32, i32) {
    %c0_i32 = arith.constant 0 : i32
    %c0_i32_0 = arith.constant 0 : i32
    return %arg1, %c0_i32 : i32, i32
  }
  func.func @transform_1(%arg0: i32, %arg1: i32) -> (i32, i32) {
    %c0_i32 = arith.constant 0 : i32
    %c0_i32_0 = arith.constant 0 : i32
    %c0_i32_1 = arith.constant 0 : i32
    return %c0_i32, %c0_i32_0 : i32, i32
  }
  func.func @transform_2(%arg0: i32, %arg1: i32) -> (i32, i32) {
    %c0_i32 = arith.constant 0 : i32
    return %arg0, %arg1 : i32, i32
  }
  func.func @transform_3(%arg0: i32, %arg1: i32) -> (i32, i32) {
    %c0_i32 = arith.constant 0 : i32
    %c0_i32_0 = arith.constant 0 : i32
    %c0_i32_1 = arith.constant 0 : i32
    return %c0_i32, %c0_i32_0 : i32, i32
  }
  func.func @transform_4(%arg0: i32, %arg1: i32) -> (i32, i32) {
    %c0_i32 = arith.constant 0 : i32
    %c0_i32_0 = arith.constant 0 : i32
    return %arg0, %c0_i32 : i32, i32
  }
}

</mosaic_0001>

<bundles_post_ra>
// kernel: tpu_custom_call.1
= control target key start
LH: loop header
LB: loop body
LE: loop exit
PB: predicated region body
PF: predicated region fallthrough
CT: control target
= control target key end

     0   :  { %9 = vsyncpa [#allocation4], 0  ;;  %s945_s0 = inlined_call_operand.hbm [shape: bf16[128,128], index: 0, kind: input, shape index: {}]   ;;  %s946_s1 = inlined_call_operand.hbm [shape: bf16[128,128], index: 1, kind: input, shape index: {}]   ;;  %s947_s2 = inlined_call_operand.hbm [shape: bf16[128,128], index: 2, kind: input, shape index: {}]   ;;  %s948_s3 = inlined_call_operand.vmem [shape: f32[1,128], index: 3, kind: input, shape index: {}]   ;;  %s949_s4 = inlined_call_operand.hbm [shape: f32[128,128], index: 4, kind: output, shape index: {}]  }
   0x1   :  { %10 = vsyncpa [#allocation7], 0 }
   0x2   :  { %11 = vsyncpa [#allocation5], 0  ;;  %s845_s15 = smov [#allocation6]   ;;  %s846_s17 = smov [#allocation3]  }
   0x3   :  { %s29_s16 = sshll.u32 %s845_s15, 4  ;;  %s17_s18 = sshll.u32 %s846_s17, 4  ;;  %s30_s16 = int_to_ptr.vmem [resolvable:$true] %s29_s16  ;;  %s878_s18 = int_to_ptr.vmem [resolvable:$true] %s17_s18 }
   0x4   :  { %s751_s21 = scalar_lea.hbm %s946_s1, 1024 }
   0x5   :  { %p752_p0 = scmp.ne.s32.totalorder %s946_s1, %s751_s21  ;;  %p755_p1 = scmp.lt.u32.totalorder %s751_s21, %s946_s1 }
   0x7   :  { %p757_p2 = pnand %p755_p1, %p752_p0 }
   0x9   :  { %760 = shalt.err (!%p757_p2)
}
   0xa   :  { %s761_s26 = scalar_lea.vmem %s30_s16, 1024  ;;  %p766_p4 = scmp.lt.s32.totalorder %s30_s16, %s30_s16 }
   0xb   :  { %p762_p3 = scmp.ne.s32.totalorder %s30_s16, %s761_s26  ;;  %p767_p5 = scmp.lt.s32.totalorder %s761_s26, %s761_s26 }
   0xd   :  { %p768_p6 = por %p767_p5, %p766_p4 }
   0xf   :  { %p769_p7 = pnand %p768_p6, %p762_p3 }
  0x11   :  { %772 = shalt.err (!%p769_p7)
}
  0x12   :  { %s847_s27 = smov 64   ;;  %s848_s28 = smov 4  }
  0x13   :  { %35 = dma.hbm_to_vmem [thread:$0]  %s946_s1, 1024, %s30_s16, [#allocation7], %s847_s27, %s847_s27, %s848_s28  }
  0x14   :  { %s773_s7 = scalar_lea.hbm %s945_s0, 1024 }
  0x15   :  { %p774_p8 = scmp.ne.s32.totalorder %s945_s0, %s773_s7  ;;  %p777_p9 = scmp.lt.u32.totalorder %s773_s7, %s945_s0 }
  0x17   :  { %p779_p10 = pnand %p777_p9, %p774_p8 }
  0x19   :  { %782 = shalt.err (!%p779_p10)
}
  0x1a   :  { %s783_s12 = scalar_lea.vmem %s878_s18, 1024  ;;  %p788_p12 = scmp.lt.s32.totalorder %s878_s18, %s878_s18 }
  0x1b   :  { %p784_p11 = scmp.ne.s32.totalorder %s878_s18, %s783_s12  ;;  %p789_p13 = scmp.lt.s32.totalorder %s783_s12, %s783_s12 }
  0x1d   :  { %p790_p0 = por %p789_p13, %p788_p12 }
  0x1f   :  { %p791_p1 = pnand %p790_p0, %p784_p11 }
  0x21   :  { %794 = shalt.err (!%p791_p1)
}
  0x22   :  { %23 = dma.hbm_to_vmem [thread:$0]  %s945_s0, 1024, %s878_s18, [#allocation4], %s847_s27, %s847_s27, %s848_s28  }
  0x23   :  { %s849_s14 = smov [#allocation8]   ;;  %s795_s19 = scalar_lea.hbm %s947_s2, 1024 }
  0x24   :  { %s41_s15 = sshll.u32 %s849_s14, 4  ;;  %p796_p2 = scmp.ne.s32.totalorder %s947_s2, %s795_s19  ;;  %s42_s15 = int_to_ptr.vmem [resolvable:$true] %s41_s15 }
  0x25   :  { %p799_p3 = scmp.lt.u32.totalorder %s795_s19, %s947_s2 }
  0x27   :  { %p801_p4 = pnand %p799_p3, %p796_p2 }
  0x29   :  { %804 = shalt.err (!%p801_p4)
}
  0x2a   :  { %s805_s24 = scalar_lea.vmem %s42_s15, 1024  ;;  %p810_p6 = scmp.lt.s32.totalorder %s42_s15, %s42_s15 }
  0x2b   :  { %p806_p5 = scmp.ne.s32.totalorder %s42_s15, %s805_s24  ;;  %p811_p7 = scmp.lt.s32.totalorder %s805_s24, %s805_s24 }
  0x2d   :  { %p812_p8 = por %p811_p7, %p810_p6 }
  0x2f   :  { %p813_p9 = pnand %p812_p8, %p806_p5 }
  0x31   :  { %816 = shalt.err (!%p813_p9)
}
  0x32   :  { %47 = dma.hbm_to_vmem [thread:$0]  %s947_s2, 1024, %s42_s15, [#allocation7], %s847_s27, %s847_s27, %s848_s28  }
  0x33   :  { %839 = dma.done.wait [#allocation4], 1024  }
  0x34   :  { %840 = vsyncadd [#allocation4], 4294966272 }
  0x35   :  { %841 = dma.done.wait [#allocation7], 2048  }
  0x36   :  { %842 = vsyncadd [#allocation7], 4294965248  ;;  %v727_v0 = vld [vmem:[#allocation6] sm:$0xff]   ;;  %v728_v1 = vld [vmem:[#allocation6 + $0x8] sm:$0xff]  }
  0x37   :  { %655 = vmatprep.subr.bf16.mxu0 %v727_v0  ;;  %v729_v2 = vld [vmem:[#allocation6 + $0x10] sm:$0xff]   ;;  %v730_v3 = vld [vmem:[#allocation6 + $0x18] sm:$0xff]   ;;  %v735_v4 = vld [vmem:[#allocation3] sm:$0xff]  }
  0x38   :  { %656 = vmatpush3.bf16.msra.mxu0 %v727_v0  ;;  %671 = vmatprep.mubr.bf16.mxu0 %v735_v4  ;;  %v731_v5 = vld [vmem:[#allocation6 + $0x20] sm:$0xff]   ;;  %v732_v6 = vld [vmem:[#allocation6 + $0x28] sm:$0xff]   ;;  %v733_v7 = vld [vmem:[#allocation6 + $0x30] sm:$0xff]  }
  0x39   :  { %657 = vmatprep.subr.bf16.mxu0 %v728_v1  ;;  %v734_v8 = vld [vmem:[#allocation6 + $0x38] sm:$0xff]   ;;  %v736_v9 = vld [vmem:[#allocation3 + $0x8] sm:$0xff]   ;;  %v737_v10 = vld [vmem:[#allocation3 + $0x10] sm:$0xff]  }
  0x3a   :  { %v738_v11 = vld [vmem:[#allocation3 + $0x18] sm:$0xff]   ;;  %v739_v12 = vld [vmem:[#allocation3 + $0x20] sm:$0xff]   ;;  %v740_v13 = vld [vmem:[#allocation3 + $0x28] sm:$0xff]  }
  0x3b   :  { %v741_v14 = vld [vmem:[#allocation3 + $0x30] sm:$0xff]   ;;  %v742_v15 = vld [vmem:[#allocation3 + $0x38] sm:$0xff]   ;;  %v743_v16 = vld [vmem:[#allocation8] sm:$0xff]  }
  0x3c   :  { %658 = vmatpush3.bf16.msra.mxu0 %v728_v1  ;;  %703 = vmatprep.mubr.bf16.mxu1 %v743_v16  ;;  %v744_v41 = vld [vmem:[#allocation8 + $0x8] sm:$0xff]   ;;  %v745_v42 = vld [vmem:[#allocation8 + $0x10] sm:$0xff]   ;;  %v746_v43 = vld [vmem:[#allocation8 + $0x18] sm:$0xff]  }
  0x3d   :  { %659 = vmatprep.subr.bf16.mxu0 %v729_v2  ;;  %v747_v44 = vld [vmem:[#allocation8 + $0x20] sm:$0xff]   ;;  %v748_v45 = vld [vmem:[#allocation8 + $0x28] sm:$0xff]   ;;  %v749_v46 = vld [vmem:[#allocation8 + $0x30] sm:$0xff]  }
  0x3e   :  { %v750_v47 = vld [vmem:[#allocation8 + $0x38] sm:$0xff]   ;;  %v622_v48 = vld [vmem:[%s948_s3] ss:$0 sm:$0xff]  ;;  %s850_s3 = smov [#allocation9]  }
  0x3f   :  { %s585_s26 = sshll.u32 %s850_s3, 4  ;;  %s586_s26 = int_to_ptr.vmem [resolvable:$true] %s585_s26 }
  0x40   :  { %660 = vmatpush3.bf16.msra.mxu0 %v729_v2  ;;  %s817_s27 = scalar_lea.vmem %s586_s26, 2048  ;;  %p822_p11 = scmp.lt.s32.totalorder %s586_s26, %s586_s26 }
  0x41   :  { %661 = vmatprep.subr.bf16.mxu0 %v730_v3  ;;  %p818_p10 = scmp.ne.s32.totalorder %s586_s26, %s817_s27  ;;  %p823_p12 = scmp.lt.s32.totalorder %s817_s27, %s817_s27 }
  0x43   :  { %p824_p13 = por %p823_p12, %p822_p11 }
  0x44   :  { %662 = vmatpush3.bf16.msra.mxu0 %v730_v3 }
  0x45   :  { %663 = vmatprep.subr.bf16.mxu0 %v731_v5  ;;  %p825_p0 = pnand %p824_p13, %p818_p10 }
  0x48   :  { %664 = vmatpush3.bf16.msra.mxu0 %v731_v5 }
  0x49   :  { %665 = vmatprep.subr.bf16.mxu0 %v732_v6 }
  0x4c   :  { %666 = vmatpush3.bf16.msra.mxu0 %v732_v6 }
  0x4d   :  { %667 = vmatprep.subr.bf16.mxu0 %v733_v7 }
  0x50   :  { %668 = vmatpush3.bf16.msra.mxu0 %v733_v7 }
  0x51   :  { %669 = vmatprep.subr.bf16.mxu0 %v734_v8 }
  0x54   :  { %670 = vmatpush3.bf16.msra.mxu0 %v734_v8 }
  0x57   :  { %672 = vmatmul.mubr.bf16.vlgmr.msra.gmra.mrb[0].mxu0 %v736_v9 }
  0x58   :  { %675 = vmatprep.mubr.bf16.mxu0 %v737_v10 }
  0x5f   :  { %676 = vmatmul.mubr.bf16.gmra.mrb[4].mxu0 %v738_v11 }
  0x60   :  { %679 = vmatprep.mubr.bf16.mxu0 %v739_v12 }
  0x67   :  { %680 = vmatmul.mubr.bf16.gmra.mrb[8].mxu0 %v740_v13 }
  0x68   :  { %683 = vmatprep.mubr.bf16.mxu0 %v741_v14 }
  0x6f   :  { %684 = vmatmul.mubr.bf16.gmra.mrb[12].mxu0 %v742_v15 }
 0x12a   :  { %v673_v17 = vpop.f32.mrb[0].mxu0 }
 0x12b   :  { %v242_v18 = vpop.f32.mrb[1].mxu0 }
 0x12c   :  { %v674_v19 = vpop.f32.mrb[2].mxu0 }
 0x12d   :  { %v338_v20 = vpack.c.bf16 %v674_v19, %v673_v17  ;;  %v245_v21 = vpop.f32.mrb[3].mxu0 }
 0x12e   :  { %v337_v22 = vpack.c.bf16 %v245_v21, %v242_v18 }
 0x130   :  { %687 = vmatprep.subr.bf16.mxu1 %v337_v22 }
 0x131   :  { %688 = vmatpush3.bf16.msra.mxu1 %v337_v22 }
 0x132   :  { %v677_v23 = vpop.f32.mrb[4].mxu0  ;;  %689 = vmatprep.subr.bf16.mxu1 %v338_v20 }
 0x133   :  { %v258_v24 = vpop.f32.mrb[5].mxu0 }
 0x134   :  { %v678_v25 = vpop.f32.mrb[6].mxu0 }
 0x135   :  { %v340_v26 = vpack.c.bf16 %v678_v25, %v677_v23  ;;  %v261_v27 = vpop.f32.mrb[7].mxu0  ;;  %690 = vmatpush3.bf16.msra.mxu1 %v338_v20 }
 0x136   :  { %v339_v28 = vpack.c.bf16 %v261_v27, %v258_v24 }
 0x138   :  { %691 = vmatprep.subr.bf16.mxu1 %v339_v28 }
 0x139   :  { %692 = vmatpush3.bf16.msra.mxu1 %v339_v28 }
 0x13a   :  { %v681_v29 = vpop.f32.mrb[8].mxu0  ;;  %693 = vmatprep.subr.bf16.mxu1 %v340_v26 }
 0x13b   :  { %v274_v30 = vpop.f32.mrb[9].mxu0 }
 0x13c   :  { %v682_v31 = vpop.f32.mrb[10].mxu0 }
 0x13d   :  { %v342_v32 = vpack.c.bf16 %v682_v31, %v681_v29  ;;  %v277_v33 = vpop.f32.mrb[11].mxu0  ;;  %694 = vmatpush3.bf16.msra.mxu1 %v340_v26 }
 0x13e   :  { %v341_v34 = vpack.c.bf16 %v277_v33, %v274_v30 }
 0x140   :  { %695 = vmatprep.subr.bf16.mxu1 %v341_v34 }
 0x141   :  { %696 = vmatpush3.bf16.msra.mxu1 %v341_v34 }
 0x142   :  { %v685_v35 = vpop.f32.mrb[12].mxu0  ;;  %697 = vmatprep.subr.bf16.mxu1 %v342_v32 }
 0x143   :  { %v290_v36 = vpop.f32.mrb[13].mxu0 }
 0x144   :  { %v686_v37 = vpop.f32.mrb[14].mxu0 }
 0x145   :  { %v344_v38 = vpack.c.bf16 %v686_v37, %v685_v35  ;;  %v293_v39 = vpop.f32.mrb[15].mxu0  ;;  %698 = vmatpush3.bf16.msra.mxu1 %v342_v32 }
 0x146   :  { %v343_v40 = vpack.c.bf16 %v293_v39, %v290_v36 }
 0x148   :  { %699 = vmatprep.subr.bf16.mxu1 %v343_v40 }
 0x149   :  { %700 = vmatpush3.bf16.msra.mxu1 %v343_v40 }
 0x14a   :  { %701 = vmatprep.subr.bf16.mxu1 %v344_v38 }
 0x14d   :  { %702 = vmatpush3.bf16.msra.mxu1 %v344_v38 }
 0x150   :  { %704 = vmatmul.mubr.bf16.vlgmr.msra.gmra.mrb[0].mxu1 %v744_v41 }
 0x151   :  { %707 = vmatprep.mubr.bf16.mxu1 %v745_v42 }
 0x158   :  { %708 = vmatmul.mubr.bf16.gmra.mrb[4].mxu1 %v746_v43 }
 0x159   :  { %711 = vmatprep.mubr.bf16.mxu1 %v747_v44 }
 0x160   :  { %712 = vmatmul.mubr.bf16.gmra.mrb[8].mxu1 %v748_v45 }
 0x161   :  { %715 = vmatprep.mubr.bf16.mxu1 %v749_v46 }
 0x168   :  { %716 = vmatmul.mubr.bf16.gmra.mrb[12].mxu1 %v750_v47 }
 0x223   :  { %v705_v49 = vpop.f32.mrb[0].mxu1 }
 0x224   :  { %v550_v50 = vadd.f32 %v705_v49, %v622_v48  ;;  %v427_v51 = vpop.f32.mrb[1].mxu1 }
 0x225   :  { %v548_v52 = vadd.f32 %v622_v48, %v427_v51  ;;  %v706_v53 = vpop.f32.mrb[2].mxu1 }
 0x226   :  { %566 = vst [vmem:[#allocation9 + $0x10] sm:$0xff] %v550_v50  ;;  %v551_v54 = vadd.f32 %v706_v53, %v622_v48  ;;  %v430_v55 = vpop.f32.mrb[3].mxu1 }
 0x227   :  { %564 = vst [vmem:[#allocation9] sm:$0xff] %v548_v52  ;;  %v549_v56 = vadd.f32 %v622_v48, %v430_v55 }
 0x228   :  { %567 = vst [vmem:[#allocation9 + $0x18] sm:$0xff] %v551_v54 }
 0x229   :  { %565 = vst [vmem:[#allocation9 + $0x8] sm:$0xff] %v549_v56 }
 0x22b   :  { %v709_v57 = vpop.f32.mrb[4].mxu1 }
 0x22c   :  { %v554_v58 = vadd.f32 %v709_v57, %v622_v48  ;;  %v443_v59 = vpop.f32.mrb[5].mxu1 }
 0x22d   :  { %v552_v60 = vadd.f32 %v622_v48, %v443_v59  ;;  %v710_v61 = vpop.f32.mrb[6].mxu1 }
 0x22e   :  { %570 = vst [vmem:[#allocation9 + $0x30] sm:$0xff] %v554_v58  ;;  %v555_v62 = vadd.f32 %v710_v61, %v622_v48  ;;  %v446_v63 = vpop.f32.mrb[7].mxu1 }
 0x22f   :  { %568 = vst [vmem:[#allocation9 + $0x20] sm:$0xff] %v552_v60  ;;  %v553_v0 = vadd.f32 %v622_v48, %v446_v63 }
 0x230   :  { %571 = vst [vmem:[#allocation9 + $0x38] sm:$0xff] %v555_v62 }
 0x231   :  { %569 = vst [vmem:[#allocation9 + $0x28] sm:$0xff] %v553_v0 }
 0x233   :  { %v713_v1 = vpop.f32.mrb[8].mxu1 }
 0x234   :  { %v558_v2 = vadd.f32 %v713_v1, %v622_v48  ;;  %v459_v3 = vpop.f32.mrb[9].mxu1 }
 0x235   :  { %v556_v4 = vadd.f32 %v622_v48, %v459_v3  ;;  %v714_v5 = vpop.f32.mrb[10].mxu1 }
 0x236   :  { %574 = vst [vmem:[#allocation9 + $0x50] sm:$0xff] %v558_v2  ;;  %v559_v6 = vadd.f32 %v714_v5, %v622_v48  ;;  %v462_v7 = vpop.f32.mrb[11].mxu1 }
 0x237   :  { %572 = vst [vmem:[#allocation9 + $0x40] sm:$0xff] %v556_v4  ;;  %v557_v8 = vadd.f32 %v622_v48, %v462_v7 }
 0x238   :  { %575 = vst [vmem:[#allocation9 + $0x58] sm:$0xff] %v559_v6 }
 0x239   :  { %573 = vst [vmem:[#allocation9 + $0x48] sm:$0xff] %v557_v8 }
 0x23b   :  { %v717_v9 = vpop.f32.mrb[12].mxu1 }
 0x23c   :  { %v562_v10 = vadd.f32 %v717_v9, %v622_v48  ;;  %v475_v11 = vpop.f32.mrb[13].mxu1 }
 0x23d   :  { %v560_v12 = vadd.f32 %v622_v48, %v475_v11  ;;  %v718_v13 = vpop.f32.mrb[14].mxu1 }
 0x23e   :  { %578 = vst [vmem:[#allocation9 + $0x70] sm:$0xff] %v562_v10  ;;  %v563_v14 = vadd.f32 %v718_v13, %v622_v48  ;;  %v478_v15 = vpop.f32.mrb[15].mxu1 }
 0x23f   :  { %576 = vst [vmem:[#allocation9 + $0x60] sm:$0xff] %v560_v12  ;;  %v561_v16 = vadd.f32 %v622_v48, %v478_v15 }
 0x240   :  { %579 = vst [vmem:[#allocation9 + $0x78] sm:$0xff] %v563_v14 }
 0x241   :  { %577 = vst [vmem:[#allocation9 + $0x68] sm:$0xff] %v561_v16 }
 0x242   :  { %828 = shalt.err (!%p825_p0)
}
 0x243   :  { %s829_s30 = scalar_lea.hbm %s949_s4, 2048 }
 0x244   :  { %p830_p1 = scmp.ne.s32.totalorder %s949_s4, %s829_s30  ;;  %p833_p2 = scmp.lt.u32.totalorder %s829_s30, %s949_s4 }
 0x246   :  { %p835_p3 = pnand %p833_p2, %p830_p1 }
 0x248   :  { %838 = shalt.err (!%p835_p3)
}
 0x249   :  { %s851_s9 = smov 128   ;;  %s852_s10 = smov 8  }
 0x24a   :  { %591 = dma.vmem_to_hbm [thread:$0]  %s586_s26, 2048, %s949_s4, [#allocation5], %s851_s9, %s851_s9, %s852_s10  }
 0x24b   :  { %843 = dma.done.wait [#allocation5], 2048  }
 0x24c   :  { %844 = vsyncadd [#allocation5], 4294965248 }
 0x24d   :  { %595 = vsyncpa [#allocation4], 1 }
 0x24e   :  { %596 = vsyncpa [#allocation7], 1 }
 0x24f   :  { %597 = vsyncpa [#allocation5], 1 }

</bundles_post_ra>
